<compile_context>
chip_gen: v7x
topology: tpu7x:2x2x1
jax: 0.10.0
libtpu: 0.0.40
codegen_flags: <defaults>
</compile_context>

<pallas_src>
import jax
import jax.numpy as jnp
from jax.experimental import pallas as pl
from jax.experimental.pallas import tpu as pltpu

SEQ_LEN = 128          # fixed by fc1: in_features = embed_dim * 128
EMBED_DIM = 64
VOCAB_SIZE = 32
BATCH = 2

H1, H2, H3 = 128, 64, 1
OUT_LANES = 128        # lane-dense output slab; real output is column 0


def _mlp_kernel(oh_ref, w1p_ref, b1_ref, w2_ref, b2_ref, w3_ref, b3_ref, o_ref):
    # oh:  (B, SEQ*V)   bf16 one-hot of tokens
    # w1p: (SEQ*V, H1)  bf16 embedding-folded fc1 weight
    # b1:  (1, H1) f32   w2: (H1, H2) bf16   b2: (1, H2) f32
    # w3:  (1, H2) f32 (fc3 weight as a row)   b3: (1, 1) f32
    # o:   (B, OUT_LANES) f32 (lane-dense; sigmoid value broadcast across lanes)

    # fc1 (embedding folded in): bf16 MXU matmul, f32 accumulation.
    h1 = jnp.dot(oh_ref[...], w1p_ref[...],
                 preferred_element_type=jnp.float32) + b1_ref[...]
    h1 = jnp.maximum(h1, 0.0)                                   # ReLU (f32 VPU)

    # fc2: bf16 operands, f32 accumulation.
    h2 = jnp.dot(h1.astype(jnp.bfloat16), w2_ref[...],
                 preferred_element_type=jnp.float32) + b2_ref[...]
    h2 = jnp.maximum(h2, 0.0)                                   # ReLU (f32 VPU)

    # fc3 (K=64, N=1): VPU multiply + lane reduce instead of an N=1 MXU matmul.
    logits = jnp.sum(h2 * w3_ref[...], axis=-1, keepdims=True) + b3_ref[...]
    probs = jax.nn.sigmoid(logits)                              # (B, 1), EUP

    # Lane-dense store.
    o_ref[...] = jnp.broadcast_to(probs, o_ref.shape)


def _vmem_spec():
    return pl.BlockSpec(memory_space=pltpu.MemorySpace.VMEM)


def prepare_params(params):
    """One-time parameter prep (like checkpoint conversion), not in the hot path.

    Folds the embedding table into fc1 and casts matmul weights to bf16.
    """
    w1r = params["w1"].reshape(SEQ_LEN, EMBED_DIM, H1)                 # (S, E, H1)
    w1p = jnp.einsum("ve,seh->svh", params["embed"], w1r)              # (S, V, H1) f32
    return {
        "w1p": w1p.reshape(SEQ_LEN * VOCAB_SIZE, H1).astype(jnp.bfloat16),
        "b1": params["b1"].astype(jnp.float32),
        "w2": params["w2"].astype(jnp.bfloat16),
        "b2": params["b2"].astype(jnp.float32),
        "w3_row": params["w3"].T.astype(jnp.float32),                  # (1, H2)
        "b3": params["b3"].astype(jnp.float32),                        # (1, 1)
    }


@jax.jit
def char_discriminator_forward(tokens, prepped):
    """tokens: int32 (B, SEQ_LEN).  Returns f32 (B, 1)."""
    B = tokens.shape[0]
    sv = SEQ_LEN * VOCAB_SIZE

    # Tiny glue: one-hot the tokens (B*SEQ int32 -> B*SEQ*V bf16, ~16 KiB).
    onehot = jax.nn.one_hot(tokens, VOCAB_SIZE, dtype=jnp.bfloat16)
    onehot = onehot.reshape(B, sv)

    bytes_accessed = (
        onehot.size * 2            # one-hot in
        + sv * H1 * 2              # w1p bf16
        + H1 * 4 + H1 * H2 * 2 + H2 * 4 + H2 * 4 + 4   # b1, w2, b2, w3, b3
        + B * OUT_LANES * 4        # lane-dense output
    )
    flops = 2 * B * (sv * H1 + H1 * H2 + H2)

    out = pl.pallas_call(
        _mlp_kernel,
        out_shape=jax.ShapeDtypeStruct((B, OUT_LANES), jnp.float32),
        in_specs=[_vmem_spec()] * 7,
        out_specs=_vmem_spec(),
        compiler_params=pltpu.CompilerParams(vmem_limit_bytes=32 * 1024 * 1024),
        cost_estimate=pl.CostEstimate(
            flops=flops, transcendentals=B, bytes_accessed=bytes_accessed),
    )(
        onehot,
        prepped["w1p"], prepped["b1"],
        prepped["w2"], prepped["b2"],
        prepped["w3_row"], prepped["b3"],
    )
    return out[:, :1]


def init_params(key):
    """Deterministic synthetic parameters matching the PyTorch module's shapes.
    Linear weights are stored transposed (in_features, out_features)."""
    ks = jax.random.split(key, 7)
    in1 = EMBED_DIM * SEQ_LEN
    return {
        "embed": jax.random.normal(ks[0], (VOCAB_SIZE, EMBED_DIM), jnp.float32),
        "w1": jax.random.normal(ks[1], (in1, H1), jnp.float32) * (1.0 / jnp.sqrt(in1)),
        "b1": jax.random.normal(ks[2], (1, H1), jnp.float32) * 0.01,
        "w2": jax.random.normal(ks[3], (H1, H2), jnp.float32) * (1.0 / jnp.sqrt(H1)),
        "b2": jax.random.normal(ks[4], (1, H2), jnp.float32) * 0.01,
        "w3": jax.random.normal(ks[5], (H2, H3), jnp.float32) * (1.0 / jnp.sqrt(H2)),
        "b3": jax.random.normal(ks[6], (1, H3), jnp.float32) * 0.01,
    }


if __name__ == "__main__":
    key = jax.random.PRNGKey(0)
    pkey, tkey = jax.random.split(key)

    params = init_params(pkey)
    prepped = prepare_params(params)
    tokens = jax.random.randint(tkey, (BATCH, SEQ_LEN), 0, VOCAB_SIZE, dtype=jnp.int32)

    out = char_discriminator_forward(tokens, prepped)
    out = jax.block_until_ready(out)

    # Pure-JAX f32 reference (original embed -> flatten -> MLP path).
    x_ref = jnp.take(params["embed"], tokens, axis=0).reshape(BATCH, -1)
    h1 = jnp.maximum(x_ref @ params["w1"] + params["b1"], 0.0)
    h2 = jnp.maximum(h1 @ params["w2"] + params["b2"], 0.0)
    ref = jax.nn.sigmoid(h2 @ params["w3"] + params["b3"])

    assert out.shape == (BATCH, 1), out.shape
    # Tolerance loosened for bf16 matmul operands (f32 accumulation).
    assert jnp.allclose(out, ref, atol=2e-2, rtol=2e-2), (out, ref)

    print("KERNEL_OK")
</pallas_src>

<mosaic_0001>
module attributes {stable_mosaic.version = 11 : i64} {
  func.func @_mlp_kernel(%arg0: memref<2x4096xbf16, #tpu.memory_space<vmem>>, %arg1: memref<4096x128xbf16, #tpu.memory_space<vmem>>, %arg2: memref<1x128xf32, #tpu.memory_space<vmem>>, %arg3: memref<128x64xbf16, #tpu.memory_space<vmem>>, %arg4: memref<1x64xf32, #tpu.memory_space<vmem>>, %arg5: memref<1x64xf32, #tpu.memory_space<vmem>>, %arg6: memref<1x1xf32, #tpu.memory_space<vmem>>, %arg7: memref<2x128xf32, #tpu.memory_space<vmem>>) attributes {dimension_semantics = [], scalar_prefetch = 0 : i64, scratch_operands = 0 : i64, tpu.core_type = #tpu.core_type<tc>} {
    %c0 = arith.constant 0 : index
    %c0_0 = arith.constant 0 : index
    %0 = vector.load %arg0[%c0, %c0_0] : memref<2x4096xbf16, #tpu.memory_space<vmem>>, vector<2x4096xbf16>
    %c0_1 = arith.constant 0 : index
    %c0_2 = arith.constant 0 : index
    %1 = vector.load %arg1[%c0_1, %c0_2] : memref<4096x128xbf16, #tpu.memory_space<vmem>>, vector<4096x128xbf16>
    %cst = arith.constant dense<0.000000e+00> : vector<2x128xf32>
    %2 = tpu.matmul %0, %1, %cst {dimension_numbers = #tpu.dot_dimension_numbers<[1], [0], [0], [1], [0, 0, 1, 1], [], []>} : vector<2x4096xbf16>, vector<4096x128xbf16>, vector<2x128xf32> -> vector<2x128xf32>
    %c0_3 = arith.constant 0 : index
    %c0_4 = arith.constant 0 : index
    %3 = vector.load %arg2[%c0_3, %c0_4] : memref<1x128xf32, #tpu.memory_space<vmem>>, vector<1x128xf32>
    %4 = vector.broadcast %3 : vector<1x128xf32> to vector<2x128xf32>
    %5 = arith.addf %2, %4 : vector<2x128xf32>
    %cst_5 = arith.constant 0.000000e+00 : f32
    %6 = vector.broadcast %cst_5 : f32 to vector<2x128xf32>
    %7 = arith.maximumf %5, %6 : vector<2x128xf32>
    %8 = arith.truncf %7 : vector<2x128xf32> to vector<2x128xbf16>
    %c0_6 = arith.constant 0 : index
    %c0_7 = arith.constant 0 : index
    %9 = vector.load %arg3[%c0_6, %c0_7] : memref<128x64xbf16, #tpu.memory_space<vmem>>, vector<128x64xbf16>
    %cst_8 = arith.constant dense<0.000000e+00> : vector<2x64xf32>
    %10 = tpu.matmul %8, %9, %cst_8 {dimension_numbers = #tpu.dot_dimension_numbers<[1], [0], [0], [1], [0, 0, 1, 1], [], []>} : vector<2x128xbf16>, vector<128x64xbf16>, vector<2x64xf32> -> vector<2x64xf32>
    %c0_9 = arith.constant 0 : index
    %c0_10 = arith.constant 0 : index
    %11 = vector.load %arg4[%c0_9, %c0_10] : memref<1x64xf32, #tpu.memory_space<vmem>>, vector<1x64xf32>
    %12 = vector.broadcast %11 : vector<1x64xf32> to vector<2x64xf32>
    %13 = arith.addf %10, %12 : vector<2x64xf32>
    %cst_11 = arith.constant 0.000000e+00 : f32
    %14 = vector.broadcast %cst_11 : f32 to vector<2x64xf32>
    %15 = arith.maximumf %13, %14 : vector<2x64xf32>
    %c0_12 = arith.constant 0 : index
    %c0_13 = arith.constant 0 : index
    %16 = vector.load %arg5[%c0_12, %c0_13] : memref<1x64xf32, #tpu.memory_space<vmem>>, vector<1x64xf32>
    %17 = vector.broadcast %16 : vector<1x64xf32> to vector<2x64xf32>
    %18 = arith.mulf %15, %17 : vector<2x64xf32>
    %cst_14 = arith.constant dense<0.000000e+00> : vector<2xf32>
    %19 = vector.multi_reduction <add>, %18, %cst_14 [1] : vector<2x64xf32> to vector<2xf32>
    %20 = vector.shape_cast %19 : vector<2xf32> to vector<2x1xf32>
    %c0_15 = arith.constant 0 : index
    %c0_16 = arith.constant 0 : index
    %21 = vector.load %arg6[%c0_15, %c0_16] : memref<1x1xf32, #tpu.memory_space<vmem>>, vector<1x1xf32>
    %22 = vector.broadcast %21 : vector<1x1xf32> to vector<2x1xf32>
    %23 = arith.addf %20, %22 : vector<2x1xf32>
    %24 = arith.negf %23 : vector<2x1xf32>
    %25 = math.exp %24 : vector<2x1xf32>
    %cst_17 = arith.constant 1.000000e+00 : f32
    %26 = vector.broadcast %cst_17 : f32 to vector<2x1xf32>
    %27 = arith.addf %26, %25 : vector<2x1xf32>
    %28 = arith.divf %26, %27 : vector<2x1xf32>
    %29 = vector.shape_cast %28 : vector<2x1xf32> to vector<2x1xf32>
    %30 = vector.broadcast %29 : vector<2x1xf32> to vector<2x128xf32>
    %c0_18 = arith.constant 0 : index
    %c0_19 = arith.constant 0 : index
    %31 = vector.load %arg7[%c0_18, %c0_19] : memref<2x128xf32, #tpu.memory_space<vmem>>, vector<2x128xf32>
    tpu.vector_store %arg7[%c0_18, %c0_19], %30 {strides = array<i32>} : memref<2x128xf32, #tpu.memory_space<vmem>>, vector<2x128xf32>,
    return
  }
}

</mosaic_0001>

<bundles_post_ra>
// kernel: char_discriminator_forward.1
= control target key start
LH: loop header
LB: loop body
LE: loop exit
PB: predicated region body
PF: predicated region fallthrough
CT: control target
= control target key end

     0   :  { %s4235_s0 = inlined_call_operand.vmem [shape: bf16[2,4096], index: 0, kind: input, shape index: {}]   ;;  %s4236_s1 = inlined_call_operand.hbm [shape: bf16[4096,128], index: 1, kind: input, shape index: {}]   ;;  %s4237_s2 = inlined_call_operand.vmem [shape: f32[1,128], index: 2, kind: input, shape index: {}]   ;;  %s4238_s3 = inlined_call_operand.vmem [shape: bf16[128,64], index: 3, kind: input, shape index: {}]   ;;  %s4239_s4 = inlined_call_operand.vmem [shape: f32[1,64], index: 4, kind: input, shape index: {}]   ;;  %s4240_s5 = inlined_call_operand.vmem [shape: f32[1,64], index: 5, kind: input, shape index: {}]   ;;  %s4241_s6 = inlined_call_operand.<no memory space> [shape: f32[1,1], index: 6, kind: input, shape index: {}]   ;;  %s4242_s7 = inlined_call_operand.vmem [shape: f32[2,128], index: 7, kind: output, shape index: {}]  }
   0x1   :  { %v12_v0 = vstv %s4241_s6 }
   0x2   :  { %13 = vst [vmem:[#allocation2] sm:$0x1] %v12_v0 }
   0x3   :  { %14 = vsyncpa [#allocation4], 0  ;;  %s4079_s26 = smov [#allocation3]   ;;  %s4055_s30 = scalar_lea.hbm %s4236_s1, 32768 }
   0x4   :  { %s22_s27 = sshll.u32 %s4079_s26, 4  ;;  %p4056_p0 = scmp.ne.s32.totalorder %s4236_s1, %s4055_s30  ;;  %s23_s27 = int_to_ptr.vmem [resolvable:$true] %s22_s27 }
   0x5   :  { %p4059_p1 = scmp.lt.u32.totalorder %s4055_s30, %s4236_s1 }
   0x7   :  { %p4061_p2 = pnand %p4059_p1, %p4056_p0 }
   0x9   :  { %4064 = shalt.err (!%p4061_p2)
}
   0xa   :  { %s4065_s6 = scalar_lea.vmem %s23_s27, 32768  ;;  %p4070_p4 = scmp.lt.s32.totalorder %s23_s27, %s23_s27 }
   0xb   :  { %p4066_p3 = scmp.ne.s32.totalorder %s23_s27, %s4065_s6  ;;  %p4071_p5 = scmp.lt.s32.totalorder %s4065_s6, %s4065_s6 }
   0xd   :  { %p4072_p6 = por %p4071_p5, %p4070_p4 }
   0xf   :  { %p4073_p7 = pnand %p4072_p6, %p4066_p3 }
  0x11   :  { %4076 = shalt.err (!%p4073_p7)
}
  0x12   :  { %s4080_s12 = smov 64   ;;  %s4081_s13 = smov 4  }
  0x13   :  { %28 = dma.hbm_to_vmem [thread:$0]  %s4236_s1, 32768, %s23_s27, [#allocation4], %s4080_s12, %s4080_s12, %s4081_s13  }
  0x14   :  { %4077 = dma.done.wait [#allocation4], 32768  }
  0x15   :  { %4078 = vsyncadd [#allocation4], 4294934528  ;;  %v3783_v1 = vld [vmem:[#allocation3 + $0x40] sm:$0xff]   ;;  %v3787_v5 = vld [vmem:[#allocation3 + $0x48] sm:$0xff]   ;;  %v4082_v23 = vmov 1966171168   ;;  %v574_v25 = vlaneseq }
  0x16   :  { %v3784_v2 = vld [vmem:[#allocation3 + $0xc0] sm:$0xff]   ;;  %3394 = vmatprep.subr.bf16.mxu0 %v3783_v1  ;;  %v3788_v6 = vld [vmem:[#allocation3 + $0xc8] sm:$0xff]   ;;  %v3791_v9 = vld [vmem:[#allocation3 + $0x50] sm:$0xff]   ;;  %v572_v24 = vunpack.c.l.s4 %v4082_v23  ;;  %vm4084_vm0 = vmmov 0   ;;  %vm3096_vm1 = vcmask 517120  }
  0x17   :  { %v3785_v3 = vld [vmem:[#allocation3] sm:$0xff]   ;;  %3416 = vmatprep.subr.bf16.mxu1 %v3784_v2  ;;  %v3789_v7 = vld [vmem:[#allocation3 + $0x8] sm:$0xff]   ;;  %v3792_v10 = vld [vmem:[#allocation3 + $0xd0] sm:$0xff]   ;;  %v575_v31 = vshrl.u32 %v574_v25, 7 }
  0x18   :  { %v3786_v4 = vld [vmem:[#allocation3 + $0x80] sm:$0xff]   ;;  %3395 = vmatpush3.bf16.msra.mxu0 %v3785_v3  ;;  %v3790_v8 = vld [vmem:[#allocation3 + $0x88] sm:$0xff]   ;;  %v3793_v11 = vld [vmem:[#allocation3 + $0x10] sm:$0xff]   ;;  %v573_v30 = vunpack.c.0.s8 %v572_v24 }
  0x19   :  { %3417 = vmatpush3.bf16.msra.mxu1 %v3786_v4  ;;  %3396 = vmatprep.subr.bf16.mxu0 %v3787_v5  ;;  %v3794_v12 = vld [vmem:[#allocation3 + $0x90] sm:$0xff]   ;;  %v3795_v13 = vld [vmem:[#allocation3 + $0x58] sm:$0xff]   ;;  %v3799_v17 = vld [vmem:[#allocation3 + $0x60] sm:$0xff]  }
  0x1a   :  { %3418 = vmatprep.subr.bf16.mxu1 %v3788_v6  ;;  %v3796_v14 = vld [vmem:[#allocation3 + $0xd8] sm:$0xff]   ;;  %v3800_v18 = vld [vmem:[#allocation3 + $0xe0] sm:$0xff]   ;;  %v3803_v21 = vld [vmem:[#allocation3 + $0x68] sm:$0xff]   ;;  %v4141_v36 = vsub.s32 %v573_v30, %v575_v31 }
  0x1b   :  { %v3797_v15 = vld [vmem:[#allocation3 + $0x18] sm:$0xff]   ;;  %v3801_v19 = vld [vmem:[#allocation3 + $0x20] sm:$0xff]   ;;  %v3804_v22 = vld [vmem:[#allocation3 + $0xe8] sm:$0xff]  }
  0x1c   :  { %3397 = vmatpush3.bf16.msra.mxu0 %v3789_v7  ;;  %v3798_v16 = vld [vmem:[#allocation3 + $0x98] sm:$0xff]   ;;  %v3802_v20 = vld [vmem:[#allocation3 + $0xa0] sm:$0xff]   ;;  %v3805_v26 = vld [vmem:[#allocation3 + $0x28] sm:$0xff]  }
  0x1d   :  { %3419 = vmatpush3.bf16.msra.mxu1 %v3790_v8  ;;  %3398 = vmatprep.subr.bf16.mxu0 %v3791_v9  ;;  %v3806_v27 = vld [vmem:[#allocation3 + $0xa8] sm:$0xff]   ;;  %v3807_v28 = vld [vmem:[#allocation3 + $0x70] sm:$0xff]   ;;  %v3811_v34 = vld [vmem:[#allocation3 + $0x78] sm:$0xff]  }
  0x1e   :  { %3420 = vmatprep.subr.bf16.mxu1 %v3792_v10  ;;  %v3808_v29 = vld [vmem:[#allocation3 + $0xf0] sm:$0xff]   ;;  %v3812_v35 = vld [vmem:[#allocation3 + $0xf8] sm:$0xff]   ;;  %v3816_v42 = vld [vmem:[#allocation3 + $0x140] sm:$0xff]  }
  0x1f   :  { %v3809_v32 = vld [vmem:[#allocation3 + $0x30] sm:$0xff]   ;;  %v3813_v37 = vld [vmem:[#allocation3 + $0x38] sm:$0xff]   ;;  %v3817_v43 = vld [vmem:[#allocation3 + $0x1c0] sm:$0xff]  }
  0x20   :  { %3399 = vmatpush3.bf16.msra.mxu0 %v3793_v11  ;;  %v3810_v33 = vld [vmem:[#allocation3 + $0xb0] sm:$0xff]   ;;  %v3814_v38 = vld [vmem:[#allocation3 + $0xb8] sm:$0xff]   ;;  %v3818_v47 = vld [vmem:[#allocation3 + $0x100] sm:$0xff]  }
  0x21   :  { %3421 = vmatpush3.bf16.msra.mxu1 %v3794_v12  ;;  %3400 = vmatprep.subr.bf16.mxu0 %v3795_v13  ;;  %v43_v39 = vld [vmem:[%s4235_s0] sm:$0xff]  ;;  %v3820_v52 = vld [vmem:[#allocation3 + $0x148] sm:$0xff]   ;;  %v3824_v59 = vld [vmem:[#allocation3 + $0x150] sm:$0xff]  }
  0x22   :  { %3422 = vmatprep.subr.bf16.mxu1 %v3796_v14  ;;  %v570_v40 = vcombine.high %v43_v39, %v43_v39  ;;  %v577_v41 = vrot.slane %v43_v39, %v4141_v36  ;;  %v3819_v49 = vld [vmem:[#allocation3 + $0x180] sm:$0xff]   ;;  %v3821_v54 = vld [vmem:[#allocation3 + $0x1c8] sm:$0xff]   ;;  %v3825_v60 = vld [vmem:[#allocation3 + $0x1d0] sm:$0xff]  }
  0x23   :  { %v3822_v56 = vld [vmem:[#allocation3 + $0x108] sm:$0xff]   ;;  %v3826_v61 = vld [vmem:[#allocation3 + $0x110] sm:$0xff]   ;;  %v3828_v63 = vld [vmem:[#allocation3 + $0x158] sm:$0xff]  }
  0x24   :  { %3401 = vmatpush3.bf16.msra.mxu0 %v3797_v15  ;;  %v585_v44 = vcombine.high %v577_v41, %v577_v41  ;;  %v593_v45 = vrot.slane %v577_v41, %v4141_v36  ;;  %v4149_v46 = vrot.slane %v570_v40, %v4141_v36  ;;  %v3823_v57 = vld [vmem:[#allocation3 + $0x188] sm:$0xff]   ;;  %v3827_v62 = vld [vmem:[#allocation3 + $0x190] sm:$0xff]   ;;  %v3829_v0 = vld [vmem:[#allocation3 + $0x1d8] sm:$0xff]  }
  0x25   :  { %3423 = vmatpush3.bf16.msra.mxu1 %v3798_v16  ;;  %3402 = vmatprep.subr.bf16.mxu0 %v3799_v17  ;;  %v3830_v1 = vld [vmem:[#allocation3 + $0x118] sm:$0xff]   ;;  %v3832_v3 = vld [vmem:[#allocation3 + $0x160] sm:$0xff]   ;;  %v3836_v7 = vld [vmem:[#allocation3 + $0x168] sm:$0xff]  }
  0x26   :  { %3424 = vmatprep.subr.bf16.mxu1 %v3800_v18  ;;  %v607_v48 = vrot.slane %v585_v44, %v4141_v36  ;;  %v586_v50 = vcombine.high %v4149_v46, %v4149_v46  ;;  %v615_v51 = vcombine.high %v593_v45, %v593_v45  ;;  %v3831_v2 = vld [vmem:[#allocation3 + $0x198] sm:$0xff]   ;;  %v3833_v4 = vld [vmem:[#allocation3 + $0x1e0] sm:$0xff]   ;;  %v3837_v8 = vld [vmem:[#allocation3 + $0x1e8] sm:$0xff]  }
  0x27   :  { %v3834_v5 = vld [vmem:[#allocation3 + $0x120] sm:$0xff]   ;;  %v3838_v9 = vld [vmem:[#allocation3 + $0x128] sm:$0xff]   ;;  %v3840_v11 = vld [vmem:[#allocation3 + $0x170] sm:$0xff]  }
  0x28   :  { %3403 = vmatpush3.bf16.msra.mxu0 %v3801_v19  ;;  %2366 = vmatprep.mubr.bf16.mxu0 %v607_v48  ;;  %v617_v53 = vcombine.high %v607_v48, %v607_v48  ;;  %v614_v55 = vrot.slane %v586_v50, %v4141_v36  ;;  %v3835_v6 = vld [vmem:[#allocation3 + $0x1a0] sm:$0xff]   ;;  %v3839_v10 = vld [vmem:[#allocation3 + $0x1a8] sm:$0xff]   ;;  %v3841_v12 = vld [vmem:[#allocation3 + $0x1f0] sm:$0xff]   ;;  %v600_v19 = vrot.slane %v4149_v46, %v4141_v36 }
  0x29   :  { %3425 = vmatpush3.bf16.msra.mxu1 %v3802_v20  ;;  %3404 = vmatprep.subr.bf16.mxu0 %v3803_v21  ;;  %v3842_v13 = vld [vmem:[#allocation3 + $0x130] sm:$0xff]   ;;  %v3844_v15 = vld [vmem:[#allocation3 + $0x178] sm:$0xff]   ;;  %v3848_v20 = vld [vmem:[#allocation3 + $0x240] sm:$0xff]  }
  0x2a   :  { %3426 = vmatprep.subr.bf16.mxu1 %v3804_v22  ;;  %2406 = vmatprep.mubr.bf16.mxu1 %v617_v53  ;;  %v618_v58 = vcombine.high %v614_v55, %v614_v55  ;;  %v3843_v14 = vld [vmem:[#allocation3 + $0x1b0] sm:$0xff]   ;;  %v3845_v16 = vld [vmem:[#allocation3 + $0x1f8] sm:$0xff]   ;;  %v3849_v21 = vld [vmem:[#allocation3 + $0x2c0] sm:$0xff]   ;;  %v616_v24 = vcombine.high %v600_v19, %v600_v19 }
  0x2b   :  { %v3846_v17 = vld [vmem:[#allocation3 + $0x138] sm:$0xff]   ;;  %v3850_v22 = vld [vmem:[#allocation3 + $0x200] sm:$0xff]   ;;  %v3852_v25 = vld [vmem:[#allocation3 + $0x248] sm:$0xff]  }
  0x2c   :  { %3405 = vmatpush3.bf16.msra.mxu0 %v3805_v26  ;;  %v3847_v18 = vld [vmem:[#allocation3 + $0x1b8] sm:$0xff]   ;;  %v3851_v23 = vld [vmem:[#allocation3 + $0x280] sm:$0xff]   ;;  %v3853_v26 = vld [vmem:[#allocation3 + $0x2c8] sm:$0xff]  }
  0x2d   :  { %3427 = vmatpush3.bf16.msra.mxu1 %v3806_v27  ;;  %3406 = vmatprep.subr.bf16.mxu0 %v3807_v28  ;;  %v3854_v27 = vld [vmem:[#allocation3 + $0x208] sm:$0xff]   ;;  %v3857_v30 = vld [vmem:[#allocation3 + $0x2d0] sm:$0xff]   ;;  %v3865_v39 = vld [vmem:[#allocation3 + $0x2e0] sm:$0xff]  }
  0x2e   :  { %3428 = vmatprep.subr.bf16.mxu1 %v3808_v29  ;;  %v3855_v28 = vld [vmem:[#allocation3 + $0x288] sm:$0xff]   ;;  %v3856_v29 = vld [vmem:[#allocation3 + $0x250] sm:$0xff]   ;;  %v3866_v40 = vld [vmem:[#allocation3 + $0x220] sm:$0xff]  }
  0x2f   :  { %v3858_v31 = vld [vmem:[#allocation3 + $0x210] sm:$0xff]   ;;  %v3867_v41 = vld [vmem:[#allocation3 + $0x2a0] sm:$0xff]   ;;  %v3870_v44 = vld [vmem:[#allocation3 + $0x228] sm:$0xff]  }
  0x30   :  { %3407 = vmatpush3.bf16.msra.mxu0 %v3809_v32  ;;  %v3859_v32 = vld [vmem:[#allocation3 + $0x290] sm:$0xff]   ;;  %v3876_v50 = vld [vmem:[#allocation3 + $0x278] sm:$0xff]   ;;  %v44_v53 = vld [vmem:[%s4235_s0 + $0x8] sm:$0xff] }
  0x31   :  { %3429 = vmatpush3.bf16.msra.mxu1 %v3810_v33  ;;  %3408 = vmatprep.subr.bf16.mxu0 %v3811_v34  ;;  %v3860_v33 = vld [vmem:[#allocation3 + $0x258] sm:$0xff]   ;;  %v3872_v46 = vld [vmem:[#allocation3 + $0x270] sm:$0xff]  }
  0x32   :  { %3430 = vmatprep.subr.bf16.mxu1 %v3812_v35  ;;  %v3861_v34 = vld [vmem:[#allocation3 + $0x2d8] sm:$0xff]   ;;  %v3874_v48 = vld [vmem:[#allocation3 + $0x230] sm:$0xff]  }
  0x33   :  { %v3862_v35 = vld [vmem:[#allocation3 + $0x218] sm:$0xff]  }
  0x34   :  { %3409 = vmatpush3.bf16.msra.mxu0 %v3813_v37  ;;  %v3863_v37 = vld [vmem:[#allocation3 + $0x298] sm:$0xff]  }
  0x35   :  { %3431 = vmatpush3.bf16.msra.mxu1 %v3814_v38  ;;  %3438 = vmatprep.subr.bf16.mxu0 %v3816_v42  ;;  %v3864_v38 = vld [vmem:[#allocation3 + $0x260] sm:$0xff]   ;;  %v3868_v42 = vld [vmem:[#allocation3 + $0x268] sm:$0xff]  }
  0x36   :  { %3460 = vmatprep.subr.bf16.mxu1 %v3817_v43  ;;  %v3869_v43 = vld [vmem:[#allocation3 + $0x2e8] sm:$0xff]  }
  0x37   :  { %2367 = vmatmul.mubr.bf16.vlgmr.msra.gmra.mrb[0].mxu0 %v593_v45  ;;  %v3871_v45 = vld [vmem:[#allocation3 + $0x2a8] sm:$0xff]  }
  0x38   :  { %3439 = vmatpush3.bf16.msra.mxu0 %v3818_v47  ;;  %2407 = vmatmul.mubr.bf16.vlgmr.msra.gmra.mrb[0].mxu1 %v615_v51  ;;  %v3873_v47 = vld [vmem:[#allocation3 + $0x2f0] sm:$0xff]   ;;  %v3877_v51 = vld [vmem:[#allocation3 + $0x2f8] sm:$0xff]  }
  0x39   :  { %3440 = vmatprep.subr.bf16.mxu0 %v3820_v52  ;;  %3461 = vmatpush3.bf16.msra.mxu1 %v3819_v49  ;;  %v3875_v49 = vld [vmem:[#allocation3 + $0x2b0] sm:$0xff]   ;;  %v3878_v52 = vld [vmem:[#allocation3 + $0x238] sm:$0xff]  }
  0x3a   :  { %2446 = vmatprep.mubr.bf16.mxu0 %v614_v55  ;;  %3462 = vmatprep.subr.bf16.mxu1 %v3821_v54  ;;  %v3879_v54 = vld [vmem:[#allocation3 + $0x2b8] sm:$0xff]   ;;  %v626_v55 = vrot.slane %v44_v53, %v4141_v36 }
  0x3b   :  { %2486 = vmatprep.mubr.bf16.mxu1 %v618_v58 }
  0x3c   :  { %3441 = vmatpush3.bf16.msra.mxu0 %v3822_v56  ;;  %v619_v56 = vcombine.high %v44_v53, %v44_v53  ;;  %v634_v58 = vcombine.high %v626_v55, %v626_v55  ;;  %v3929_v53 = vld [vmem:[#allocation3 + $0x460] sm:$0xff]  }
  0x3d   :  { %3442 = vmatprep.subr.bf16.mxu0 %v3824_v59  ;;  %3463 = vmatpush3.bf16.msra.mxu1 %v3823_v57  ;;  %v3880_v57 = vld [vmem:[#allocation3 + $0x340] sm:$0xff]   ;;  %v642_v59 = vrot.slane %v626_v55, %v4141_v36 }
  0x3e   :  { %3464 = vmatprep.subr.bf16.mxu1 %v3825_v60  ;;  %v3881_v60 = vld [vmem:[#allocation3 + $0x3c0] sm:$0xff]  }
  0x3f   :  { %v3931_v55 = vld [vmem:[#allocation3 + $0x420] sm:$0xff]  }
  0x40   :  { %3443 = vmatpush3.bf16.msra.mxu0 %v3826_v61  ;;  %v4163_v61 = vrot.slane %v619_v56, %v4141_v36  ;;  %v3932_v56 = vld [vmem:[#allocation3 + $0x4a0] sm:$0xff]  }
  0x41   :  { %3444 = vmatprep.subr.bf16.mxu0 %v3828_v63  ;;  %3465 = vmatpush3.bf16.msra.mxu1 %v3827_v62  ;;  %v3882_v62 = vld [vmem:[#allocation3 + $0x300] sm:$0xff]   ;;  %v656_v63 = vrot.slane %v634_v58, %v4141_v36  ;;  %v3934_v58 = vld [vmem:[#allocation3 + $0x4e8] sm:$0xff]  }
  0x42   :  { %3466 = vmatprep.subr.bf16.mxu1 %v3829_v0  ;;  %v3883_v0 = vld [vmem:[#allocation3 + $0x380] sm:$0xff]  }
  0x44   :  { %3445 = vmatpush3.bf16.msra.mxu0 %v3830_v1  ;;  %v635_v1 = vcombine.high %v4163_v61, %v4163_v61 }
  0x45   :  { %3446 = vmatprep.subr.bf16.mxu0 %v3832_v3  ;;  %3467 = vmatpush3.bf16.msra.mxu1 %v3831_v2  ;;  %v664_v2 = vcombine.high %v642_v59, %v642_v59  ;;  %v3884_v3 = vld [vmem:[#allocation3 + $0x348] sm:$0xff]  }
  0x46   :  { %3468 = vmatprep.subr.bf16.mxu1 %v3833_v4  ;;  %v666_v4 = vcombine.high %v656_v63, %v656_v63 }
  0x48   :  { %3447 = vmatpush3.bf16.msra.mxu0 %v3834_v5  ;;  %v3885_v5 = vld [vmem:[#allocation3 + $0x3c8] sm:$0xff]  }
  0x49   :  { %3448 = vmatprep.subr.bf16.mxu0 %v3836_v7  ;;  %3469 = vmatpush3.bf16.msra.mxu1 %v3835_v6  ;;  %v663_v6 = vrot.slane %v635_v1, %v4141_v36  ;;  %v3886_v7 = vld [vmem:[#allocation3 + $0x308] sm:$0xff]   ;;  %v3941_v1 = vld [vmem:[#allocation3 + $0x478] sm:$0xff]  }
  0x4a   :  { %3470 = vmatprep.subr.bf16.mxu1 %v3837_v8  ;;  %v3887_v8 = vld [vmem:[#allocation3 + $0x388] sm:$0xff]  }
  0x4c   :  { %3449 = vmatpush3.bf16.msra.mxu0 %v3838_v9  ;;  %v667_v9 = vcombine.high %v663_v6, %v663_v6 }
  0x4d   :  { %3450 = vmatprep.subr.bf16.mxu0 %v3840_v11  ;;  %3471 = vmatpush3.bf16.msra.mxu1 %v3839_v10  ;;  %v3888_v10 = vld [vmem:[#allocation3 + $0x350] sm:$0xff]  }
  0x4e   :  { %3472 = vmatprep.subr.bf16.mxu1 %v3841_v12  ;;  %v3889_v11 = vld [vmem:[#allocation3 + $0x3d0] sm:$0xff]  }
  0x4f   :  { %v3890_v12 = vld [vmem:[#allocation3 + $0x310] sm:$0xff]  }
  0x50   :  { %3451 = vmatpush3.bf16.msra.mxu0 %v3842_v13  ;;  %v3891_v13 = vld [vmem:[#allocation3 + $0x390] sm:$0xff]  }
  0x51   :  { %3452 = vmatprep.subr.bf16.mxu0 %v3844_v15  ;;  %3473 = vmatpush3.bf16.msra.mxu1 %v3843_v14  ;;  %v3892_v14 = vld [vmem:[#allocation3 + $0x358] sm:$0xff]  }
  0x52   :  { %3474 = vmatprep.subr.bf16.mxu1 %v3845_v16  ;;  %v3893_v15 = vld [vmem:[#allocation3 + $0x3d8] sm:$0xff]  }
  0x53   :  { %v3894_v16 = vld [vmem:[#allocation3 + $0x318] sm:$0xff]  }
  0x54   :  { %3453 = vmatpush3.bf16.msra.mxu0 %v3846_v17  ;;  %v3895_v17 = vld [vmem:[#allocation3 + $0x398] sm:$0xff]  }
  0x55   :  { %3482 = vmatprep.subr.bf16.mxu0 %v3848_v20  ;;  %3475 = vmatpush3.bf16.msra.mxu1 %v3847_v18  ;;  %v3896_v18 = vld [vmem:[#allocation3 + $0x360] sm:$0xff]  }
  0x56   :  { %3504 = vmatprep.subr.bf16.mxu1 %v3849_v21  ;;  %v3898_v20 = vld [vmem:[#allocation3 + $0x320] sm:$0xff]  }
  0x57   :  { %2447 = vmatmul.mubr.bf16.vlgmr.msra.gmra.mrb[4].mxu0 %v600_v19  ;;  %v3897_v19 = vld [vmem:[#allocation3 + $0x3e0] sm:$0xff]  }
  0x58   :  { %3483 = vmatpush3.bf16.msra.mxu0 %v3850_v22  ;;  %2487 = vmatmul.mubr.bf16.vlgmr.msra.gmra.mrb[4].mxu1 %v616_v24  ;;  %v3899_v21 = vld [vmem:[#allocation3 + $0x3a0] sm:$0xff]   ;;  %v3900_v22 = vld [vmem:[#allocation3 + $0x368] sm:$0xff]  }
  0x59   :  { %3484 = vmatprep.subr.bf16.mxu0 %v3852_v25  ;;  %3505 = vmatpush3.bf16.msra.mxu1 %v3851_v23  ;;  %v3901_v23 = vld [vmem:[#allocation3 + $0x3e8] sm:$0xff]  }
  0x5a   :  { %3506 = vmatprep.subr.bf16.mxu1 %v3853_v26  ;;  %2526 = vmatprep.mubr.bf16.mxu0 %v656_v63  ;;  %v3902_v24 = vld [vmem:[#allocation3 + $0x328] sm:$0xff]   ;;  %v3904_v26 = vld [vmem:[#allocation3 + $0x370] sm:$0xff]  }
  0x5b   :  { %2566 = vmatprep.mubr.bf16.mxu1 %v666_v4  ;;  %v3903_v25 = vld [vmem:[#allocation3 + $0x3a8] sm:$0xff]   ;;  %v3939_v63 = vld [vmem:[#allocation3 + $0x430] sm:$0xff]  }
  0x5c   :  { %3485 = vmatpush3.bf16.msra.mxu0 %v3854_v27  ;;  %v3905_v27 = vld [vmem:[#allocation3 + $0x3f0] sm:$0xff]  }
  0x5d   :  { %3486 = vmatprep.subr.bf16.mxu0 %v3856_v29  ;;  %3507 = vmatpush3.bf16.msra.mxu1 %v3855_v28  ;;  %v3906_v28 = vld [vmem:[#allocation3 + $0x330] sm:$0xff]  }
  0x5e   :  { %3508 = vmatprep.subr.bf16.mxu1 %v3857_v30  ;;  %v3907_v29 = vld [vmem:[#allocation3 + $0x3b0] sm:$0xff]   ;;  %v3908_v30 = vld [vmem:[#allocation3 + $0x378] sm:$0xff]  }
  0x5f   :  { %v45_v4 = vld [vmem:[%s4235_s0 + $0x10] sm:$0xff] }
  0x60   :  { %3487 = vmatpush3.bf16.msra.mxu0 %v3858_v31  ;;  %v3909_v31 = vld [vmem:[#allocation3 + $0x3f8] sm:$0xff]  }
  0x61   :  { %3488 = vmatprep.subr.bf16.mxu0 %v3860_v33  ;;  %3509 = vmatpush3.bf16.msra.mxu1 %v3859_v32  ;;  %v3910_v32 = vld [vmem:[#allocation3 + $0x338] sm:$0xff]  }
  0x62   :  { %3510 = vmatprep.subr.bf16.mxu1 %v3861_v34  ;;  %v3911_v33 = vld [vmem:[#allocation3 + $0x3b8] sm:$0xff]   ;;  %v649_v34 = vrot.slane %v4163_v61, %v4141_v36  ;;  %v3937_v61 = vld [vmem:[#allocation3 + $0x470] sm:$0xff]  }
  0x64   :  { %3489 = vmatpush3.bf16.msra.mxu0 %v3862_v35  ;;  %v3913_v35 = vld [vmem:[#allocation3 + $0x440] sm:$0xff]  }
  0x65   :  { %3490 = vmatprep.subr.bf16.mxu0 %v3864_v38  ;;  %3511 = vmatpush3.bf16.msra.mxu1 %v3863_v37  ;;  %v3914_v37 = vld [vmem:[#allocation3 + $0x4c0] sm:$0xff]  }
  0x66   :  { %3512 = vmatprep.subr.bf16.mxu1 %v3865_v39  ;;  %v3915_v38 = vld [vmem:[#allocation3 + $0x400] sm:$0xff]  }
  0x67   :  { %v3916_v39 = vld [vmem:[#allocation3 + $0x480] sm:$0xff]  }
  0x68   :  { %3491 = vmatpush3.bf16.msra.mxu0 %v3866_v40  ;;  %v665_v40 = vcombine.high %v649_v34, %v649_v34 }
  0x69   :  { %3492 = vmatprep.subr.bf16.mxu0 %v3868_v42  ;;  %3513 = vmatpush3.bf16.msra.mxu1 %v3867_v41  ;;  %v3917_v41 = vld [vmem:[#allocation3 + $0x448] sm:$0xff]  }
  0x6a   :  { %3514 = vmatprep.subr.bf16.mxu1 %v3869_v43  ;;  %v3918_v42 = vld [vmem:[#allocation3 + $0x4c8] sm:$0xff]  }
  0x6b   :  { %v3919_v43 = vld [vmem:[#allocation3 + $0x408] sm:$0xff]  }
  0x6c   :  { %3493 = vmatpush3.bf16.msra.mxu0 %v3870_v44  ;;  %v3920_v44 = vld [vmem:[#allocation3 + $0x488] sm:$0xff]  }
  0x6d   :  { %3494 = vmatprep.subr.bf16.mxu0 %v3872_v46  ;;  %3515 = vmatpush3.bf16.msra.mxu1 %v3871_v45  ;;  %v3921_v45 = vld [vmem:[#allocation3 + $0x450] sm:$0xff]  }
  0x6e   :  { %3516 = vmatprep.subr.bf16.mxu1 %v3873_v47  ;;  %v3922_v46 = vld [vmem:[#allocation3 + $0x4d0] sm:$0xff]  }
  0x6f   :  { %v3923_v47 = vld [vmem:[#allocation3 + $0x410] sm:$0xff]  }
  0x70   :  { %3495 = vmatpush3.bf16.msra.mxu0 %v3874_v48  ;;  %v3924_v48 = vld [vmem:[#allocation3 + $0x490] sm:$0xff]  }
  0x71   :  { %3496 = vmatprep.subr.bf16.mxu0 %v3876_v50  ;;  %3517 = vmatpush3.bf16.msra.mxu1 %v3875_v49  ;;  %v3925_v49 = vld [vmem:[#allocation3 + $0x458] sm:$0xff]  }
  0x72   :  { %3518 = vmatprep.subr.bf16.mxu1 %v3877_v51  ;;  %v3926_v50 = vld [vmem:[#allocation3 + $0x4d8] sm:$0xff]  }
  0x73   :  { %v3927_v51 = vld [vmem:[#allocation3 + $0x418] sm:$0xff]  }
  0x74   :  { %3497 = vmatpush3.bf16.msra.mxu0 %v3878_v52  ;;  %v3928_v52 = vld [vmem:[#allocation3 + $0x498] sm:$0xff]  }
  0x75   :  { %3526 = vmatprep.subr.bf16.mxu0 %v3880_v57  ;;  %3519 = vmatpush3.bf16.msra.mxu1 %v3879_v54  ;;  %v3930_v54 = vld [vmem:[#allocation3 + $0x4e0] sm:$0xff]   ;;  %v3933_v57 = vld [vmem:[#allocation3 + $0x468] sm:$0xff]  }
  0x76   :  { %3548 = vmatprep.subr.bf16.mxu1 %v3881_v60  ;;  %v3936_v60 = vld [vmem:[#allocation3 + $0x4a8] sm:$0xff]  }
  0x77   :  { %2527 = vmatmul.mubr.bf16.vlgmr.msra.gmra.mrb[8].mxu0 %v642_v59  ;;  %v3935_v59 = vld [vmem:[#allocation3 + $0x428] sm:$0xff]  }
  0x78   :  { %3527 = vmatpush3.bf16.msra.mxu0 %v3882_v62  ;;  %2567 = vmatmul.mubr.bf16.vlgmr.msra.gmra.mrb[8].mxu1 %v664_v2  ;;  %v3938_v62 = vld [vmem:[#allocation3 + $0x4f0] sm:$0xff]   ;;  %v3942_v2 = vld [vmem:[#allocation3 + $0x4f8] sm:$0xff]  }
  0x79   :  { %3528 = vmatprep.subr.bf16.mxu0 %v3884_v3  ;;  %3549 = vmatpush3.bf16.msra.mxu1 %v3883_v0  ;;  %v3940_v0 = vld [vmem:[#allocation3 + $0x4b0] sm:$0xff]   ;;  %v3943_v3 = vld [vmem:[#allocation3 + $0x438] sm:$0xff]  }
  0x7a   :  { %2606 = vmatprep.mubr.bf16.mxu0 %v663_v6  ;;  %3550 = vmatprep.subr.bf16.mxu1 %v3885_v5  ;;  %v3944_v5 = vld [vmem:[#allocation3 + $0x4b8] sm:$0xff]   ;;  %v675_v6 = vrot.slane %v45_v4, %v4141_v36 }
  0x7b   :  { %2646 = vmatprep.mubr.bf16.mxu1 %v667_v9 }
  0x7c   :  { %3529 = vmatpush3.bf16.msra.mxu0 %v3886_v7  ;;  %v668_v7 = vcombine.high %v45_v4, %v45_v4  ;;  %v683_v9 = vcombine.high %v675_v6, %v675_v6  ;;  %v3994_v4 = vld [vmem:[#allocation3 + $0x660] sm:$0xff]  }
  0x7d   :  { %3530 = vmatprep.subr.bf16.mxu0 %v3888_v10  ;;  %3551 = vmatpush3.bf16.msra.mxu1 %v3887_v8  ;;  %v3945_v8 = vld [vmem:[#allocation3 + $0x540] sm:$0xff]   ;;  %v691_v10 = vrot.slane %v675_v6, %v4141_v36 }
  0x7e   :  { %3552 = vmatprep.subr.bf16.mxu1 %v3889_v11  ;;  %v3946_v11 = vld [vmem:[#allocation3 + $0x5c0] sm:$0xff]  }
  0x7f   :  { %v3996_v6 = vld [vmem:[#allocation3 + $0x620] sm:$0xff]  }
  0x80   :  { %3531 = vmatpush3.bf16.msra.mxu0 %v3890_v12  ;;  %v4177_v12 = vrot.slane %v668_v7, %v4141_v36  ;;  %v3997_v7 = vld [vmem:[#allocation3 + $0x6a0] sm:$0xff]  }
  0x81   :  { %3532 = vmatprep.subr.bf16.mxu0 %v3892_v14  ;;  %3553 = vmatpush3.bf16.msra.mxu1 %v3891_v13  ;;  %v3947_v13 = vld [vmem:[#allocation3 + $0x500] sm:$0xff]   ;;  %v705_v14 = vrot.slane %v683_v9, %v4141_v36  ;;  %v3999_v9 = vld [vmem:[#allocation3 + $0x6e8] sm:$0xff]  }
  0x82   :  { %3554 = vmatprep.subr.bf16.mxu1 %v3893_v15  ;;  %v3948_v15 = vld [vmem:[#allocation3 + $0x580] sm:$0xff]  }
  0x84   :  { %3533 = vmatpush3.bf16.msra.mxu0 %v3894_v16  ;;  %v684_v16 = vcombine.high %v4177_v12, %v4177_v12 }
  0x85   :  { %3534 = vmatprep.subr.bf16.mxu0 %v3896_v18  ;;  %3555 = vmatpush3.bf16.msra.mxu1 %v3895_v17  ;;  %v713_v17 = vcombine.high %v691_v10, %v691_v10  ;;  %v3949_v18 = vld [vmem:[#allocation3 + $0x548] sm:$0xff]  }
  0x86   :  { %3556 = vmatprep.subr.bf16.mxu1 %v3897_v19  ;;  %v715_v19 = vcombine.high %v705_v14, %v705_v14 }
  0x88   :  { %3535 = vmatpush3.bf16.msra.mxu0 %v3898_v20  ;;  %v3950_v20 = vld [vmem:[#allocation3 + $0x5c8] sm:$0xff]  }
  0x89   :  { %3536 = vmatprep.subr.bf16.mxu0 %v3900_v22  ;;  %3557 = vmatpush3.bf16.msra.mxu1 %v3899_v21  ;;  %v712_v21 = vrot.slane %v684_v16, %v4141_v36  ;;  %v3951_v22 = vld [vmem:[#allocation3 + $0x508] sm:$0xff]   ;;  %v4006_v16 = vld [vmem:[#allocation3 + $0x678] sm:$0xff]  }
  0x8a   :  { %3558 = vmatprep.subr.bf16.mxu1 %v3901_v23  ;;  %v3952_v23 = vld [vmem:[#allocation3 + $0x588] sm:$0xff]  }
  0x8c   :  { %3537 = vmatpush3.bf16.msra.mxu0 %v3902_v24  ;;  %v716_v24 = vcombine.high %v712_v21, %v712_v21 }
  0x8d   :  { %3538 = vmatprep.subr.bf16.mxu0 %v3904_v26  ;;  %3559 = vmatpush3.bf16.msra.mxu1 %v3903_v25  ;;  %v3953_v25 = vld [vmem:[#allocation3 + $0x550] sm:$0xff]  }
  0x8e   :  { %3560 = vmatprep.subr.bf16.mxu1 %v3905_v27  ;;  %v3954_v26 = vld [vmem:[#allocation3 + $0x5d0] sm:$0xff]  }
  0x8f   :  { %v3955_v27 = vld [vmem:[#allocation3 + $0x510] sm:$0xff]  }
  0x90   :  { %3539 = vmatpush3.bf16.msra.mxu0 %v3906_v28  ;;  %v3956_v28 = vld [vmem:[#allocation3 + $0x590] sm:$0xff]  }
  0x91   :  { %3540 = vmatprep.subr.bf16.mxu0 %v3908_v30  ;;  %3561 = vmatpush3.bf16.msra.mxu1 %v3907_v29  ;;  %v3957_v29 = vld [vmem:[#allocation3 + $0x558] sm:$0xff]  }
  0x92   :  { %3562 = vmatprep.subr.bf16.mxu1 %v3909_v31  ;;  %v3958_v30 = vld [vmem:[#allocation3 + $0x5d8] sm:$0xff]  }
  0x93   :  { %v3959_v31 = vld [vmem:[#allocation3 + $0x518] sm:$0xff]  }
  0x94   :  { %3541 = vmatpush3.bf16.msra.mxu0 %v3910_v32  ;;  %v3960_v32 = vld [vmem:[#allocation3 + $0x598] sm:$0xff]  }
  0x95   :  { %3570 = vmatprep.subr.bf16.mxu0 %v3913_v35  ;;  %3563 = vmatpush3.bf16.msra.mxu1 %v3911_v33  ;;  %v3961_v33 = vld [vmem:[#allocation3 + $0x560] sm:$0xff]  }
  0x96   :  { %3592 = vmatprep.subr.bf16.mxu1 %v3914_v37  ;;  %v3963_v35 = vld [vmem:[#allocation3 + $0x520] sm:$0xff]  }
  0x97   :  { %2607 = vmatmul.mubr.bf16.vlgmr.msra.gmra.mrb[12].mxu0 %v649_v34  ;;  %v3962_v34 = vld [vmem:[#allocation3 + $0x5e0] sm:$0xff]  }
  0x98   :  { %3571 = vmatpush3.bf16.msra.mxu0 %v3915_v38  ;;  %2647 = vmatmul.mubr.bf16.vlgmr.msra.gmra.mrb[12].mxu1 %v665_v40  ;;  %v3964_v37 = vld [vmem:[#allocation3 + $0x5a0] sm:$0xff]   ;;  %v3965_v38 = vld [vmem:[#allocation3 + $0x568] sm:$0xff]  }
  0x99   :  { %3572 = vmatprep.subr.bf16.mxu0 %v3917_v41  ;;  %3593 = vmatpush3.bf16.msra.mxu1 %v3916_v39  ;;  %v3966_v39 = vld [vmem:[#allocation3 + $0x5e8] sm:$0xff]  }
  0x9a   :  { %3594 = vmatprep.subr.bf16.mxu1 %v3918_v42  ;;  %2686 = vmatprep.mubr.bf16.mxu0 %v705_v14  ;;  %v3967_v40 = vld [vmem:[#allocation3 + $0x528] sm:$0xff]   ;;  %v3969_v42 = vld [vmem:[#allocation3 + $0x570] sm:$0xff]  }
  0x9b   :  { %2726 = vmatprep.mubr.bf16.mxu1 %v715_v19  ;;  %v3968_v41 = vld [vmem:[#allocation3 + $0x5a8] sm:$0xff]   ;;  %v4004_v14 = vld [vmem:[#allocation3 + $0x630] sm:$0xff]  }
  0x9c   :  { %3573 = vmatpush3.bf16.msra.mxu0 %v3919_v43  ;;  %v3970_v43 = vld [vmem:[#allocation3 + $0x5f0] sm:$0xff]  }
  0x9d   :  { %3574 = vmatprep.subr.bf16.mxu0 %v3921_v45  ;;  %3595 = vmatpush3.bf16.msra.mxu1 %v3920_v44  ;;  %v3971_v44 = vld [vmem:[#allocation3 + $0x530] sm:$0xff]  }
  0x9e   :  { %3596 = vmatprep.subr.bf16.mxu1 %v3922_v46  ;;  %v3972_v45 = vld [vmem:[#allocation3 + $0x5b0] sm:$0xff]   ;;  %v3973_v46 = vld [vmem:[#allocation3 + $0x578] sm:$0xff]  }
  0x9f   :  { %v46_v19 = vld [vmem:[%s4235_s0 + $0x18] sm:$0xff] }
  0xa0   :  { %3575 = vmatpush3.bf16.msra.mxu0 %v3923_v47  ;;  %v3974_v47 = vld [vmem:[#allocation3 + $0x5f8] sm:$0xff]  }
  0xa1   :  { %3576 = vmatprep.subr.bf16.mxu0 %v3925_v49  ;;  %3597 = vmatpush3.bf16.msra.mxu1 %v3924_v48  ;;  %v3975_v48 = vld [vmem:[#allocation3 + $0x538] sm:$0xff]  }
  0xa2   :  { %3598 = vmatprep.subr.bf16.mxu1 %v3926_v50  ;;  %v3976_v49 = vld [vmem:[#allocation3 + $0x5b8] sm:$0xff]   ;;  %v698_v50 = vrot.slane %v4177_v12, %v4141_v36  ;;  %v4002_v12 = vld [vmem:[#allocation3 + $0x670] sm:$0xff]  }
  0xa4   :  { %3577 = vmatpush3.bf16.msra.mxu0 %v3927_v51  ;;  %v3978_v51 = vld [vmem:[#allocation3 + $0x640] sm:$0xff]  }
  0xa5   :  { %3578 = vmatprep.subr.bf16.mxu0 %v3929_v53  ;;  %3599 = vmatpush3.bf16.msra.mxu1 %v3928_v52  ;;  %v3979_v52 = vld [vmem:[#allocation3 + $0x6c0] sm:$0xff]  }
  0xa6   :  { %3600 = vmatprep.subr.bf16.mxu1 %v3930_v54  ;;  %v3980_v53 = vld [vmem:[#allocation3 + $0x600] sm:$0xff]  }
  0xa7   :  { %v3981_v54 = vld [vmem:[#allocation3 + $0x680] sm:$0xff]  }
  0xa8   :  { %3579 = vmatpush3.bf16.msra.mxu0 %v3931_v55  ;;  %v714_v55 = vcombine.high %v698_v50, %v698_v50 }
  0xa9   :  { %3580 = vmatprep.subr.bf16.mxu0 %v3933_v57  ;;  %3601 = vmatpush3.bf16.msra.mxu1 %v3932_v56  ;;  %v3982_v56 = vld [vmem:[#allocation3 + $0x648] sm:$0xff]  }
  0xaa   :  { %3602 = vmatprep.subr.bf16.mxu1 %v3934_v58  ;;  %v3983_v57 = vld [vmem:[#allocation3 + $0x6c8] sm:$0xff]  }
  0xab   :  { %v3984_v58 = vld [vmem:[#allocation3 + $0x608] sm:$0xff]  }
  0xac   :  { %3581 = vmatpush3.bf16.msra.mxu0 %v3935_v59  ;;  %v3985_v59 = vld [vmem:[#allocation3 + $0x688] sm:$0xff]  }
  0xad   :  { %3582 = vmatprep.subr.bf16.mxu0 %v3937_v61  ;;  %3603 = vmatpush3.bf16.msra.mxu1 %v3936_v60  ;;  %v3986_v60 = vld [vmem:[#allocation3 + $0x650] sm:$0xff]  }
  0xae   :  { %3604 = vmatprep.subr.bf16.mxu1 %v3938_v62  ;;  %v3987_v61 = vld [vmem:[#allocation3 + $0x6d0] sm:$0xff]  }
  0xaf   :  { %v3988_v62 = vld [vmem:[#allocation3 + $0x610] sm:$0xff]  }
  0xb0   :  { %3583 = vmatpush3.bf16.msra.mxu0 %v3939_v63  ;;  %v3989_v63 = vld [vmem:[#allocation3 + $0x690] sm:$0xff]  }
  0xb1   :  { %3584 = vmatprep.subr.bf16.mxu0 %v3941_v1  ;;  %3605 = vmatpush3.bf16.msra.mxu1 %v3940_v0  ;;  %v3990_v0 = vld [vmem:[#allocation3 + $0x658] sm:$0xff]  }
  0xb2   :  { %3606 = vmatprep.subr.bf16.mxu1 %v3942_v2  ;;  %v3991_v1 = vld [vmem:[#allocation3 + $0x6d8] sm:$0xff]  }
  0xb3   :  { %v3992_v2 = vld [vmem:[#allocation3 + $0x618] sm:$0xff]  }
  0xb4   :  { %3585 = vmatpush3.bf16.msra.mxu0 %v3943_v3  ;;  %v3993_v3 = vld [vmem:[#allocation3 + $0x698] sm:$0xff]  }
  0xb5   :  { %3614 = vmatprep.subr.bf16.mxu0 %v3945_v8  ;;  %3607 = vmatpush3.bf16.msra.mxu1 %v3944_v5  ;;  %v3995_v5 = vld [vmem:[#allocation3 + $0x6e0] sm:$0xff]   ;;  %v3998_v8 = vld [vmem:[#allocation3 + $0x668] sm:$0xff]  }
  0xb6   :  { %3636 = vmatprep.subr.bf16.mxu1 %v3946_v11  ;;  %v4001_v11 = vld [vmem:[#allocation3 + $0x6a8] sm:$0xff]  }
  0xb7   :  { %2687 = vmatmul.mubr.bf16.vlgmr.msra.gmra.mrb[16].mxu0 %v691_v10  ;;  %v4000_v10 = vld [vmem:[#allocation3 + $0x628] sm:$0xff]  }
  0xb8   :  { %3615 = vmatpush3.bf16.msra.mxu0 %v3947_v13  ;;  %2727 = vmatmul.mubr.bf16.vlgmr.msra.gmra.mrb[16].mxu1 %v713_v17  ;;  %v4003_v13 = vld [vmem:[#allocation3 + $0x6f0] sm:$0xff]   ;;  %v4007_v17 = vld [vmem:[#allocation3 + $0x6f8] sm:$0xff]  }
  0xb9   :  { %3616 = vmatprep.subr.bf16.mxu0 %v3949_v18  ;;  %3637 = vmatpush3.bf16.msra.mxu1 %v3948_v15  ;;  %v4005_v15 = vld [vmem:[#allocation3 + $0x6b0] sm:$0xff]   ;;  %v4008_v18 = vld [vmem:[#allocation3 + $0x638] sm:$0xff]  }
  0xba   :  { %2766 = vmatprep.mubr.bf16.mxu0 %v712_v21  ;;  %3638 = vmatprep.subr.bf16.mxu1 %v3950_v20  ;;  %v724_v20 = vrot.slane %v46_v19, %v4141_v36  ;;  %v4010_v21 = vld [vmem:[#allocation3 + $0x740] sm:$0xff]  }
  0xbb   :  { %2806 = vmatprep.mubr.bf16.mxu1 %v716_v24 }
  0xbc   :  { %3617 = vmatpush3.bf16.msra.mxu0 %v3951_v22  ;;  %v717_v22 = vcombine.high %v46_v19, %v46_v19  ;;  %v732_v24 = vcombine.high %v724_v20, %v724_v20 }
  0xbd   :  { %3618 = vmatprep.subr.bf16.mxu0 %v3953_v25  ;;  %3639 = vmatpush3.bf16.msra.mxu1 %v3952_v23  ;;  %v4009_v23 = vld [vmem:[#allocation3 + $0x6b8] sm:$0xff]   ;;  %v740_v25 = vrot.slane %v724_v20, %v4141_v36 }
  0xbe   :  { %3640 = vmatprep.subr.bf16.mxu1 %v3954_v26  ;;  %v4011_v26 = vld [vmem:[#allocation3 + $0x7c0] sm:$0xff]  }
  0xc0   :  { %3619 = vmatpush3.bf16.msra.mxu0 %v3955_v27  ;;  %v4191_v27 = vrot.slane %v717_v22, %v4141_v36 }
  0xc1   :  { %3620 = vmatprep.subr.bf16.mxu0 %v3957_v29  ;;  %3641 = vmatpush3.bf16.msra.mxu1 %v3956_v28  ;;  %v754_v28 = vrot.slane %v732_v24, %v4141_v36  ;;  %v4012_v29 = vld [vmem:[#allocation3 + $0x700] sm:$0xff]  }
  0xc2   :  { %3642 = vmatprep.subr.bf16.mxu1 %v3958_v30  ;;  %v733_v30 = vcombine.high %v4191_v27, %v4191_v27 }
  0xc4   :  { %3621 = vmatpush3.bf16.msra.mxu0 %v3959_v31  ;;  %v762_v31 = vcombine.high %v740_v25, %v740_v25 }
  0xc5   :  { %3622 = vmatprep.subr.bf16.mxu0 %v3961_v33  ;;  %3643 = vmatpush3.bf16.msra.mxu1 %v3960_v32  ;;  %v4014_v32 = vld [vmem:[#allocation3 + $0x748] sm:$0xff]   ;;  %v764_v33 = vcombine.high %v754_v28, %v754_v28 }
  0xc6   :  { %3644 = vmatprep.subr.bf16.mxu1 %v3962_v34  ;;  %v4013_v34 = vld [vmem:[#allocation3 + $0x780] sm:$0xff]  }
  0xc8   :  { %3623 = vmatpush3.bf16.msra.mxu0 %v3963_v35  ;;  %v761_v35 = vrot.slane %v733_v30, %v4141_v36 }
  0xc9   :  { %3624 = vmatprep.subr.bf16.mxu0 %v3965_v38  ;;  %3645 = vmatpush3.bf16.msra.mxu1 %v3964_v37  ;;  %v4015_v37 = vld [vmem:[#allocation3 + $0x7c8] sm:$0xff]  }
  0xca   :  { %3646 = vmatprep.subr.bf16.mxu1 %v3966_v39  ;;  %v4016_v38 = vld [vmem:[#allocation3 + $0x708] sm:$0xff]   ;;  %v765_v39 = vcombine.high %v761_v35, %v761_v35 }
  0xcc   :  { %3625 = vmatpush3.bf16.msra.mxu0 %v3967_v40  ;;  %v4018_v40 = vld [vmem:[#allocation3 + $0x750] sm:$0xff]  }
  0xcd   :  { %3626 = vmatprep.subr.bf16.mxu0 %v3969_v42  ;;  %3647 = vmatpush3.bf16.msra.mxu1 %v3968_v41  ;;  %v4017_v41 = vld [vmem:[#allocation3 + $0x788] sm:$0xff]   ;;  %v4019_v42 = vld [vmem:[#allocation3 + $0x7d0] sm:$0xff]  }
  0xce   :  { %3648 = vmatprep.subr.bf16.mxu1 %v3970_v43  ;;  %v4020_v43 = vld [vmem:[#allocation3 + $0x710] sm:$0xff]  }
  0xd0   :  { %3627 = vmatpush3.bf16.msra.mxu0 %v3971_v44  ;;  %v4022_v44 = vld [vmem:[#allocation3 + $0x758] sm:$0xff]  }
  0xd1   :  { %3628 = vmatprep.subr.bf16.mxu0 %v3973_v46  ;;  %3649 = vmatpush3.bf16.msra.mxu1 %v3972_v45  ;;  %v4021_v45 = vld [vmem:[#allocation3 + $0x790] sm:$0xff]   ;;  %v4023_v46 = vld [vmem:[#allocation3 + $0x7d8] sm:$0xff]  }
  0xd2   :  { %3650 = vmatprep.subr.bf16.mxu1 %v3974_v47  ;;  %v4024_v47 = vld [vmem:[#allocation3 + $0x718] sm:$0xff]  }
  0xd4   :  { %3629 = vmatpush3.bf16.msra.mxu0 %v3975_v48  ;;  %v4026_v48 = vld [vmem:[#allocation3 + $0x760] sm:$0xff]  }
  0xd5   :  { %3658 = vmatprep.subr.bf16.mxu0 %v3978_v51  ;;  %3651 = vmatpush3.bf16.msra.mxu1 %v3976_v49  ;;  %v4025_v49 = vld [vmem:[#allocation3 + $0x798] sm:$0xff]   ;;  %v4028_v51 = vld [vmem:[#allocation3 + $0x720] sm:$0xff]  }
  0xd6   :  { %3680 = vmatprep.subr.bf16.mxu1 %v3979_v52  ;;  %v4030_v52 = vld [vmem:[#allocation3 + $0x768] sm:$0xff]  }
  0xd7   :  { %2767 = vmatmul.mubr.bf16.vlgmr.msra.gmra.mrb[20].mxu0 %v698_v50  ;;  %v4027_v50 = vld [vmem:[#allocation3 + $0x7e0] sm:$0xff]  }
  0xd8   :  { %3659 = vmatpush3.bf16.msra.mxu0 %v3980_v53  ;;  %2807 = vmatmul.mubr.bf16.vlgmr.msra.gmra.mrb[20].mxu1 %v714_v55  ;;  %v4029_v53 = vld [vmem:[#allocation3 + $0x7a0] sm:$0xff]   ;;  %v3125_v55 = vld [vmem:[%s4237_s2] ss:$0 sm:$0xff] }
  0xd9   :  { %3660 = vmatprep.subr.bf16.mxu0 %v3982_v56  ;;  %3681 = vmatpush3.bf16.msra.mxu1 %v3981_v54  ;;  %v4031_v54 = vld [vmem:[#allocation3 + $0x7e8] sm:$0xff]  }
  0xda   :  { %3682 = vmatprep.subr.bf16.mxu1 %v3983_v57  ;;  %2846 = vmatprep.mubr.bf16.mxu0 %v754_v28  ;;  %v4032_v56 = vld [vmem:[#allocation3 + $0x728] sm:$0xff]  }
  0xdb   :  { %2886 = vmatprep.mubr.bf16.mxu1 %v764_v33 }
  0xdc   :  { %3661 = vmatpush3.bf16.msra.mxu0 %v3984_v58  ;;  %v4034_v58 = vld [vmem:[#allocation3 + $0x770] sm:$0xff]  }
  0xdd   :  { %3662 = vmatprep.subr.bf16.mxu0 %v3986_v60  ;;  %3683 = vmatpush3.bf16.msra.mxu1 %v3985_v59  ;;  %v4033_v60 = vld [vmem:[#allocation3 + $0x7a8] sm:$0xff]  }
  0xde   :  { %3684 = vmatprep.subr.bf16.mxu1 %v3987_v61 }
  0xe0   :  { %3663 = vmatpush3.bf16.msra.mxu0 %v3988_v62 }
  0xe1   :  { %3664 = vmatprep.subr.bf16.mxu0 %v3990_v0  ;;  %3685 = vmatpush3.bf16.msra.mxu1 %v3989_v63  ;;  %v4035_v0 = vld [vmem:[#allocation3 + $0x7f0] sm:$0xff]  }
  0xe2   :  { %3686 = vmatprep.subr.bf16.mxu1 %v3991_v1  ;;  %v4036_v1 = vld [vmem:[#allocation3 + $0x730] sm:$0xff]  }
  0xe4   :  { %3665 = vmatpush3.bf16.msra.mxu0 %v3992_v2 }
  0xe5   :  { %3666 = vmatprep.subr.bf16.mxu0 %v3994_v4  ;;  %3687 = vmatpush3.bf16.msra.mxu1 %v3993_v3  ;;  %v4037_v4 = vld [vmem:[#allocation3 + $0x7b0] sm:$0xff]  }
  0xe6   :  { %3688 = vmatprep.subr.bf16.mxu1 %v3995_v5 }
  0xe8   :  { %3667 = vmatpush3.bf16.msra.mxu0 %v3996_v6 }
  0xe9   :  { %3668 = vmatprep.subr.bf16.mxu0 %v3998_v8  ;;  %3689 = vmatpush3.bf16.msra.mxu1 %v3997_v7  ;;  %v4038_v8 = vld [vmem:[#allocation3 + $0x778] sm:$0xff]  }
  0xea   :  { %3690 = vmatprep.subr.bf16.mxu1 %v3999_v9 }
  0xec   :  { %3669 = vmatpush3.bf16.msra.mxu0 %v4000_v10  ;;  %v4039_v10 = vld [vmem:[#allocation3 + $0x7f8] sm:$0xff]  }
  0xed   :  { %3670 = vmatprep.subr.bf16.mxu0 %v4002_v12  ;;  %3691 = vmatpush3.bf16.msra.mxu1 %v4001_v11  ;;  %v4040_v12 = vld [vmem:[#allocation3 + $0x738] sm:$0xff]  }
  0xee   :  { %3692 = vmatprep.subr.bf16.mxu1 %v4003_v13  ;;  %v4041_v13 = vld [vmem:[#allocation3 + $0x7b8] sm:$0xff]  }
  0xf0   :  { %3671 = vmatpush3.bf16.msra.mxu0 %v4004_v14  ;;  %v747_v14 = vrot.slane %v4191_v27, %v4141_v36 }
  0xf1   :  { %3672 = vmatprep.subr.bf16.mxu0 %v4006_v16  ;;  %3693 = vmatpush3.bf16.msra.mxu1 %v4005_v15 }
  0xf2   :  { %3694 = vmatprep.subr.bf16.mxu1 %v4007_v17  ;;  %v763_v15 = vcombine.high %v747_v14, %v747_v14 }
  0xf4   :  { %3673 = vmatpush3.bf16.msra.mxu0 %v4008_v18 }
  0xf5   :  { %3702 = vmatprep.subr.bf16.mxu0 %v4010_v21  ;;  %3695 = vmatpush3.bf16.msra.mxu1 %v4009_v23 }
  0xf6   :  { %3724 = vmatprep.subr.bf16.mxu1 %v4011_v26 }
  0xf7   :  { %2847 = vmatmul.mubr.bf16.vlgmr.msra.gmra.mrb[24].mxu0 %v740_v25 }
  0xf8   :  { %3703 = vmatpush3.bf16.msra.mxu0 %v4012_v29  ;;  %2887 = vmatmul.mubr.bf16.vlgmr.msra.gmra.mrb[24].mxu1 %v762_v31 }
  0xf9   :  { %3704 = vmatprep.subr.bf16.mxu0 %v4014_v32  ;;  %3725 = vmatpush3.bf16.msra.mxu1 %v4013_v34 }
  0xfa   :  { %2926 = vmatprep.mubr.bf16.mxu0 %v761_v35  ;;  %3726 = vmatprep.subr.bf16.mxu1 %v4015_v37 }
  0xfb   :  { %2966 = vmatprep.mubr.bf16.mxu1 %v765_v39 }
  0xfc   :  { %3705 = vmatpush3.bf16.msra.mxu0 %v4016_v38 }
  0xfd   :  { %3706 = vmatprep.subr.bf16.mxu0 %v4018_v40  ;;  %3727 = vmatpush3.bf16.msra.mxu1 %v4017_v41  ;;  %v4043_v40 = vld [vmem:[%s4238_s3] sm:$0xff]   ;;  %v4083_v41 = vmov 0.0  }
  0xfe   :  { %3728 = vmatprep.subr.bf16.mxu1 %v4019_v42  ;;  %v4044_v42 = vld [vmem:[%s4238_s3 + $0x8] sm:$0xff]  }
 0x100   :  { %3707 = vmatpush3.bf16.msra.mxu0 %v4020_v43  ;;  %v4045_v43 = vld [vmem:[%s4238_s3 + $0x10] sm:$0xff]  }
 0x101   :  { %3708 = vmatprep.subr.bf16.mxu0 %v4022_v44  ;;  %3729 = vmatpush3.bf16.msra.mxu1 %v4021_v45  ;;  %v4046_v44 = vld [vmem:[%s4238_s3 + $0x18] sm:$0xff]   ;;  %v4047_v45 = vld [vmem:[%s4238_s3 + $0x20] sm:$0xff]  }
 0x102   :  { %3730 = vmatprep.subr.bf16.mxu1 %v4023_v46 }
 0x104   :  { %3709 = vmatpush3.bf16.msra.mxu0 %v4024_v47 }
 0x105   :  { %3710 = vmatprep.subr.bf16.mxu0 %v4026_v48  ;;  %3731 = vmatpush3.bf16.msra.mxu1 %v4025_v49 }
 0x106   :  { %3732 = vmatprep.subr.bf16.mxu1 %v4027_v50 }
 0x108   :  { %3711 = vmatpush3.bf16.msra.mxu0 %v4028_v51  ;;  %v4048_v51 = vld [vmem:[%s4238_s3 + $0x28] sm:$0xff]  }
 0x109   :  { %3712 = vmatprep.subr.bf16.mxu0 %v4030_v52  ;;  %3733 = vmatpush3.bf16.msra.mxu1 %v4029_v53 }
 0x10a   :  { %v3410_v57 = vpop.f32.mrb[0].mxu0  ;;  %3734 = vmatprep.subr.bf16.mxu1 %v4031_v54 }
 0x10b   :  { %v3411_v59 = vpop.f32.mrb[1].mxu0  ;;  %v3432_v61 = vpop.f32.mrb[0].mxu1 }
 0x10c   :  { %v3412_v62 = vadd.f32 %v3411_v59, %v3410_v57  ;;  %v3413_v63 = vpop.f32.mrb[2].mxu0  ;;  %v3433_v2 = vpop.f32.mrb[1].mxu1  ;;  %3713 = vmatpush3.bf16.msra.mxu0 %v4032_v56  ;;  %v4049_v59 = vld [vmem:[%s4238_s3 + $0x30] sm:$0xff]  }
 0x10d   :  { %v3414_v3 = vpop.f32.mrb[3].mxu0  ;;  %v3434_v6 = vadd.f32 %v3433_v2, %v3432_v61  ;;  %v3435_v7 = vpop.f32.mrb[2].mxu1  ;;  %3714 = vmatprep.subr.bf16.mxu0 %v4034_v58  ;;  %3735 = vmatpush3.bf16.msra.mxu1 %v4033_v60  ;;  %v4050_v60 = vld [vmem:[%s4238_s3 + $0x38] sm:$0xff]  }
 0x10e   :  { %v2369_v5 = vadd.f32 %v3412_v62, %v3125_v55  ;;  %v3436_v9 = vpop.f32.mrb[3].mxu1  ;;  %3736 = vmatprep.subr.bf16.mxu1 %v4035_v0 }
 0x110   :  { %v2409_v11 = vadd.f32 %v3434_v6, %v2369_v5  ;;  %3715 = vmatpush3.bf16.msra.mxu0 %v4036_v1 }
 0x111   :  { %3716 = vmatprep.subr.bf16.mxu0 %v4038_v8  ;;  %3737 = vmatpush3.bf16.msra.mxu1 %v4037_v4 }
 0x112   :  { %3738 = vmatprep.subr.bf16.mxu1 %v4039_v10 }
 0x114   :  { %3717 = vmatpush3.bf16.msra.mxu0 %v4040_v12 }
 0x115   :  { %3739 = vmatpush3.bf16.msra.mxu1 %v4041_v13  ;;  %3755 = vmatprep.subr.bf16.mxu0 %v4083_v41 }
 0x117   :  { %2927 = vmatmul.mubr.bf16.vlgmr.msra.gmra.mrb[28].mxu0 %v747_v14 }
 0x118   :  { %2967 = vmatmul.mubr.bf16.vlgmr.msra.gmra.mrb[28].mxu1 %v763_v15  ;;  %3756 = vmatpush3.bf16.msra.mxu0 %v4043_v40 }
 0x119   :  { %3757 = vmatprep.subr.bf16.mxu0 %v4083_v41  ;;  %3771 = vmatprep.mubr.msk.bf16.mxu0 %vm4084_vm0, %v4083_v41 }
 0x11c   :  { %3758 = vmatpush3.bf16.msra.mxu0 %v4044_v42 }
 0x11d   :  { %3759 = vmatprep.subr.bf16.mxu0 %v4083_v41 }
 0x120   :  { %3760 = vmatpush3.bf16.msra.mxu0 %v4045_v43 }
 0x121   :  { %3761 = vmatprep.subr.bf16.mxu0 %v4083_v41 }
 0x124   :  { %3762 = vmatpush3.bf16.msra.mxu0 %v4046_v44 }
 0x125   :  { %3763 = vmatprep.subr.bf16.mxu0 %v4083_v41 }
 0x128   :  { %3764 = vmatpush3.bf16.msra.mxu0 %v4047_v45 }
 0x129   :  { %3765 = vmatprep.subr.bf16.mxu0 %v4083_v41 }
 0x12a   :  { %v3454_v16 = vpop.f32.mrb[4].mxu0 }
 0x12b   :  { %v3455_v17 = vpop.f32.mrb[5].mxu0  ;;  %v3476_v18 = vpop.f32.mrb[4].mxu1 }
 0x12c   :  { %v3456_v19 = vadd.f32 %v3455_v17, %v3454_v16  ;;  %v3457_v20 = vpop.f32.mrb[6].mxu0  ;;  %v3477_v21 = vpop.f32.mrb[5].mxu1  ;;  %3766 = vmatpush3.bf16.msra.mxu0 %v4048_v51 }
 0x12d   :  { %v3458_v22 = vpop.f32.mrb[7].mxu0  ;;  %v3478_v24 = vadd.f32 %v3477_v21, %v3476_v18  ;;  %v3479_v25 = vpop.f32.mrb[6].mxu1  ;;  %3767 = vmatprep.subr.bf16.mxu0 %v4083_v41 }
 0x12e   :  { %v2449_v23 = vadd.f32 %v3456_v19, %v2409_v11  ;;  %v3480_v26 = vpop.f32.mrb[7].mxu1 }
 0x130   :  { %v2489_v28 = vadd.f32 %v3478_v24, %v2449_v23  ;;  %3768 = vmatpush3.bf16.msra.mxu0 %v4049_v59 }
 0x131   :  { %3769 = vmatprep.subr.bf16.mxu0 %v4083_v41 }
 0x134   :  { %3770 = vmatpush3.bf16.msra.mxu0 %v4050_v60 }
 0x14a   :  { %v3498_v36 = vpop.f32.mrb[8].mxu0 }
 0x14b   :  { %v3499_v27 = vpop.f32.mrb[9].mxu0  ;;  %v3520_v29 = vpop.f32.mrb[8].mxu1 }
 0x14c   :  { %v3500_v30 = vadd.f32 %v3499_v27, %v3498_v36  ;;  %v3501_v31 = vpop.f32.mrb[10].mxu0  ;;  %v3521_v32 = vpop.f32.mrb[9].mxu1 }
 0x14d   :  { %v3502_v33 = vpop.f32.mrb[11].mxu0  ;;  %v3522_v35 = vadd.f32 %v3521_v32, %v3520_v29  ;;  %v3523_v37 = vpop.f32.mrb[10].mxu1 }
 0x14e   :  { %v2529_v34 = vadd.f32 %v3500_v30, %v2489_v28  ;;  %v3524_v38 = vpop.f32.mrb[11].mxu1 }
 0x150   :  { %v2569_v39 = vadd.f32 %v3522_v35, %v2529_v34 }
 0x16a   :  { %v3542_v46 = vpop.f32.mrb[12].mxu0 }
 0x16b   :  { %v3543_v47 = vpop.f32.mrb[13].mxu0  ;;  %v3564_v48 = vpop.f32.mrb[12].mxu1 }
 0x16c   :  { %v3544_v49 = vadd.f32 %v3543_v47, %v3542_v46  ;;  %v3545_v50 = vpop.f32.mrb[14].mxu0  ;;  %v3565_v52 = vpop.f32.mrb[13].mxu1  ;;  %v3382_v47 = vld [vmem:[%s4239_s4] ss:$0 sm:$0xff] }
 0x16d   :  { %v3546_v53 = vpop.f32.mrb[15].mxu0  ;;  %v3566_v55 = vadd.f32 %v3565_v52, %v3564_v48  ;;  %v3567_v56 = vpop.f32.mrb[14].mxu1  ;;  %v3391_v52 = vld [vmem:[%s4240_s5] ss:$0 sm:$0xff] }
 0x16e   :  { %v2609_v54 = vadd.f32 %v3544_v49, %v2569_v39  ;;  %v3568_v57 = vpop.f32.mrb[15].mxu1 }
 0x16f   :  { %v4085_v57 = vmov 0  }
 0x170   :  { %v2649_v58 = vadd.f32 %v3566_v55, %v2609_v54  ;;  %3782 = vset.pattern.permute.xlu0 %v4085_v57 }
 0x18a   :  { %v3586_v61 = vpop.f32.mrb[16].mxu0 }
 0x18b   :  { %v3587_v62 = vpop.f32.mrb[17].mxu0  ;;  %v3608_v63 = vpop.f32.mrb[16].mxu1 }
 0x18c   :  { %v3588_v0 = vadd.f32 %v3587_v62, %v3586_v61  ;;  %v3589_v1 = vpop.f32.mrb[18].mxu0  ;;  %v3609_v2 = vpop.f32.mrb[17].mxu1 }
 0x18d   :  { %v3590_v3 = vpop.f32.mrb[19].mxu0  ;;  %v3610_v5 = vadd.f32 %v3609_v2, %v3608_v63  ;;  %v3611_v6 = vpop.f32.mrb[18].mxu1 }
 0x18e   :  { %v2689_v4 = vadd.f32 %v3588_v0, %v2649_v58  ;;  %v3612_v7 = vpop.f32.mrb[19].mxu1  ;;  %v3392_v58 = vld [vmem:[#allocation2] ss:$0 sm:$0xff] }
 0x190   :  { %v2729_v8 = vadd.f32 %v3610_v5, %v2689_v4 }
 0x1aa   :  { %v3630_v9 = vpop.f32.mrb[20].mxu0 }
 0x1ab   :  { %v3631_v10 = vpop.f32.mrb[21].mxu0  ;;  %v3652_v11 = vpop.f32.mrb[20].mxu1 }
 0x1ac   :  { %v3632_v12 = vadd.f32 %v3631_v10, %v3630_v9  ;;  %v3633_v13 = vpop.f32.mrb[22].mxu0  ;;  %v3653_v14 = vpop.f32.mrb[21].mxu1 }
 0x1ad   :  { %v3634_v15 = vpop.f32.mrb[23].mxu0  ;;  %v3654_v17 = vadd.f32 %v3653_v14, %v3652_v11  ;;  %v3655_v18 = vpop.f32.mrb[22].mxu1 }
 0x1ae   :  { %v2769_v16 = vadd.f32 %v3632_v12, %v2729_v8  ;;  %v3656_v19 = vpop.f32.mrb[23].mxu1 }
 0x1b0   :  { %v2809_v20 = vadd.f32 %v3654_v17, %v2769_v16 }
 0x1ca   :  { %v3674_v21 = vpop.f32.mrb[24].mxu0 }
 0x1cb   :  { %v3675_v22 = vpop.f32.mrb[25].mxu0  ;;  %v3696_v23 = vpop.f32.mrb[24].mxu1 }
 0x1cc   :  { %v3676_v24 = vadd.f32 %v3675_v22, %v3674_v21  ;;  %v3677_v25 = vpop.f32.mrb[26].mxu0  ;;  %v3697_v26 = vpop.f32.mrb[25].mxu1 }
 0x1cd   :  { %v3678_v28 = vpop.f32.mrb[27].mxu0  ;;  %v3698_v27 = vadd.f32 %v3697_v26, %v3696_v23  ;;  %v3699_v29 = vpop.f32.mrb[26].mxu1 }
 0x1ce   :  { %v2849_v36 = vadd.f32 %v3676_v24, %v2809_v20  ;;  %v3700_v30 = vpop.f32.mrb[27].mxu1 }
 0x1d0   :  { %v2889_v31 = vadd.f32 %v3698_v27, %v2849_v36 }
 0x1ea   :  { %v3718_v32 = vpop.f32.mrb[28].mxu0 }
 0x1eb   :  { %v3719_v33 = vpop.f32.mrb[29].mxu0  ;;  %v3740_v34 = vpop.f32.mrb[28].mxu1 }
 0x1ec   :  { %v3720_v35 = vadd.f32 %v3719_v33, %v3718_v32  ;;  %v3721_v37 = vpop.f32.mrb[30].mxu0  ;;  %v3741_v38 = vpop.f32.mrb[29].mxu1 }
 0x1ed   :  { %v3722_v39 = vpop.f32.mrb[31].mxu0  ;;  %v3742_v41 = vadd.f32 %v3741_v38, %v3740_v34  ;;  %v3743_v42 = vpop.f32.mrb[30].mxu1 }
 0x1ee   :  { %v2929_v40 = vadd.f32 %v3720_v35, %v2889_v31  ;;  %v3744_v43 = vpop.f32.mrb[31].mxu1 }
 0x1f0   :  { %v2969_v44 = vadd.f32 %v3742_v41, %v2929_v40 }
 0x1f2   :  { %v2974_v45 = vmax.f32 %v2969_v44, 0.0 }
 0x1f4   :  { %v2975_v46 = vpack.c.bf16 %v2974_v45, %v2974_v45 }
 0x1f6   :  { %3772 = vmatmul.mubr.bf16.vlgmr.msra.gmra.mrb[32].mxu0 %v2975_v46 }
 0x2c9   :  { %v3081_v48 = vpop.f32.mrb[32].mxu0 }
 0x2ca   :  { %v3082_v49 = vadd.f32 %v3382_v47, %v3081_v48  ;;  %v3773_v50 = vpop.f32.mrb[33].mxu0 }
 0x2cb   :  { %v3084_v51 = vpop.f32.mrb[34].mxu0 }
 0x2cc   :  { %v3087_v53 = vmax.f32 %v3082_v49, 0.0  ;;  %v3774_v54 = vpop.f32.mrb[35].mxu0 }
 0x2ce   :  { %v3095_v55 = vmul.f32 %v3391_v52, %v3087_v53 }
 0x2d0   :  { %v3097_v56 = vsel %vm3096_vm1, %v3095_v55, 0.0 }
 0x2d1   :  { %3098 = vadd.xlane.f32.xlu0 %v3097_v56 }
 0x35e   :  { %v3099_v59 = vpop.xlane.xlu0 %3098 }
 0x35f   :  { %v3107_v60 = vadd.f32 %v3392_v58, %v3099_v59 }
 0x361   :  { %v3393_v61 = vmul.f32 -1.442695, %v3107_v60 }
 0x363   :  { %4051 = vpow2.f32 %v3393_v61 }
 0x36d   :  { %v4052_v62 = vpop.eup %4051 }
 0x36e   :  { %v3111_v63 = vadd.f32 1.0, %v4052_v62 }
 0x370   :  { %4053 = vrcp.f32 %v3111_v63 }
 0x37a   :  { %v4054_v0 = vpop.eup %4053 }
 0x37b   :  { %3116 = vperm.xlu0 %3782, %v4054_v0  }
 0x3fa   :  { %v3117_v1 = vpop.permute.xlu0 %3116 }
 0x3fb   :  { %3119 = vst [vmem:[%s4242_s7] sm:$0x3] %v3117_v1 }
 0x3fc   :  { %3124 = vsyncpa [#allocation4], 1 }

</bundles_post_ra>
